<compile_context>
chip_gen: v7x
topology: tpu7x:2x2x1
jax: 0.10.0
libtpu: 0.0.40
codegen_flags: <defaults>
</compile_context>

<pallas_src>
import functools

import jax
import jax.numpy as jnp
import numpy as np
from jax.experimental import pallas as pl
from jax.experimental.pallas import tpu as pltpu

LANES = 128
SUBLANES = 8
MAX_BLOCK_ROWS = 512  # 512*128*4B = 256 KiB per stream per pipeline buffer


def _round_up(x, m):
    return ((x + m - 1) // m) * m


def _qfl_elementwise(x, t, beta):
    """focal_weight * BCE_with_logits, element-wise, float32.

    Shares a single exp(-|x|) between the sigmoid and the numerically stable
    BCE term instead of calling sigmoid and log1p(exp(-|x|)) independently.
    """
    e = jnp.exp(-jnp.abs(x))                      # exp(-|x|) in (0, 1]
    inv = pl.reciprocal(1.0 + e, approx=False)    # 1 / (1 + e)
    sig = jnp.where(x >= 0.0, inv, e * inv)       # sigmoid(x)
    diff = jnp.abs(t - sig)
    # |target - sigmoid(pred)| ** beta (exact square for the default beta=2,
    # guarded exp/log path otherwise so diff == 0 stays 0, not NaN).
    if float(beta) == 2.0:
        focal = diff * diff
    else:
        safe = jnp.where(diff > 0.0, diff, 1.0)
        focal = jnp.where(diff > 0.0, jnp.exp(beta * jnp.log(safe)), 0.0)
    # Stable binary_cross_entropy_with_logits (reduction='none').
    bce = jnp.maximum(x, 0.0) - x * t + jnp.log1p(e)
    return focal * bce


def _qfl_elem_kernel(*refs, beta, has_weight):
    """Element-wise loss output ('none' reduction path)."""
    if has_weight:
        pred_ref, tgt_ref, w_ref, loss_ref = refs
    else:
        pred_ref, tgt_ref, loss_ref = refs
    x = pred_ref[...].astype(jnp.float32)
    t = tgt_ref[...].astype(jnp.float32)
    l = _qfl_elementwise(x, t, beta)
    if has_weight:
        l = l * w_ref[...].astype(jnp.float32)
    loss_ref[...] = l.astype(loss_ref.dtype)


def _qfl_sum_kernel(*refs, beta, has_weight, block_rows, n_valid):
    """Per-block (8,128) lane-parallel partial sums ('sum'/'mean' path)."""
    if has_weight:
        pred_ref, tgt_ref, w_ref, psum_ref = refs
    else:
        pred_ref, tgt_ref, psum_ref = refs
    x = pred_ref[...].astype(jnp.float32)
    t = tgt_ref[...].astype(jnp.float32)
    l = _qfl_elementwise(x, t, beta)
    if has_weight:
        l = l * w_ref[...].astype(jnp.float32)
    if n_valid is not None:
        # Mask out padded tail elements (global flat index >= n_valid).
        row0 = pl.program_id(0) * block_rows
        row_i = jax.lax.broadcasted_iota(jnp.int32, (block_rows, LANES), 0)
        lane_i = jax.lax.broadcasted_iota(jnp.int32, (block_rows, LANES), 1)
        flat = (row0 + row_i) * LANES + lane_i
        l = jnp.where(flat < n_valid, l, 0.0)
    # (block_rows, 128) -> (8, 128): sublane-aligned vector adds only; the
    # single cross-lane reduce happens on the tiny output in the wrapper.
    psum = l.reshape(block_rows // SUBLANES, SUBLANES, LANES).sum(axis=0)
    psum_ref[...] = psum.reshape(1, SUBLANES, LANES)


def _qfl_elem_call(inputs, beta, block_rows, has_weight):
    rows, _ = inputs[0].shape
    num_blocks = rows // block_rows
    elem_spec = pl.BlockSpec((block_rows, LANES), lambda i: (i, 0))
    return pl.pallas_call(
        functools.partial(_qfl_elem_kernel, beta=beta, has_weight=has_weight),
        out_shape=jax.ShapeDtypeStruct((rows, LANES), jnp.float32),
        grid_spec=pltpu.PrefetchScalarGridSpec(
            num_scalar_prefetch=0,
            grid=(num_blocks,),
            in_specs=[elem_spec] * len(inputs),
            out_specs=elem_spec,
        ),
        compiler_params=pltpu.CompilerParams(
            dimension_semantics=("parallel",)),
    )(*inputs)


def _qfl_sum_call(inputs, beta, block_rows, has_weight, n_valid):
    rows, _ = inputs[0].shape
    num_blocks = rows // block_rows
    elem_spec = pl.BlockSpec((block_rows, LANES), lambda i: (i, 0))
    psum_spec = pl.BlockSpec((1, SUBLANES, LANES), lambda i: (i, 0, 0))
    return pl.pallas_call(
        functools.partial(_qfl_sum_kernel, beta=beta, has_weight=has_weight,
                          block_rows=block_rows, n_valid=n_valid),
        out_shape=jax.ShapeDtypeStruct((num_blocks, SUBLANES, LANES),
                                       jnp.float32),
        grid_spec=pltpu.PrefetchScalarGridSpec(
            num_scalar_prefetch=0,
            grid=(num_blocks,),
            in_specs=[elem_spec] * len(inputs),
            out_specs=psum_spec,
        ),
        compiler_params=pltpu.CompilerParams(
            dimension_semantics=("parallel",)),
    )(*inputs)


class QualityOnlyFocalLoss:
    """JAX/Pallas port of mmdet QualityOnlyFocalLoss (no learnable params)."""

    def __init__(self, beta=2.0, reduction="mean", loss_weight=1.0):
        self.beta = beta
        self.reduction = reduction
        self.loss_weight = loss_weight

    def __call__(self, pred, target, weight=None, avg_factor=None,
                 reduction_override=None):
        assert reduction_override in (None, "none", "mean", "sum")
        reduction = reduction_override if reduction_override else self.reduction

        pred = jnp.asarray(pred, jnp.float32).reshape(-1)
        target = jnp.asarray(target, jnp.float32).reshape(-1)
        n = int(pred.shape[0])
        has_weight = weight is not None
        if has_weight:
            weight = jnp.asarray(weight, jnp.float32).reshape(-1)

        # Lane-dense (rows, 128) layout; row blocks as large as possible (up to
        # MAX_BLOCK_ROWS) to amortize per-grid-step overhead.  Pad the flat
        # vectors to one block granularity so every block is full.
        rows = _round_up(max(1, -(-n // LANES)), SUBLANES)
        block_rows = min(MAX_BLOCK_ROWS, rows)
        total_rows = _round_up(rows, block_rows)
        padded_n = total_rows * LANES
        n_pad = padded_n - n

        def _pad2d(v):
            v = jnp.pad(v, (0, n_pad)) if n_pad else v
            return v.reshape(total_rows, LANES)

        inputs = [_pad2d(pred), _pad2d(target)]
        if has_weight:
            inputs.append(_pad2d(weight))

        if reduction == "none":
            loss_elem = _qfl_elem_call(inputs, self.beta, block_rows, has_weight)
            out = loss_elem.reshape(-1)[:n]
        else:
            psums = _qfl_sum_call(inputs, self.beta, block_rows, has_weight,
                                  n_valid=(n if n_pad else None))
            total = jnp.sum(psums)
            if reduction == "sum":
                out = total
            else:  # 'mean' (mmdet weight_reduce_loss semantics)
                denom = jnp.float32(n if avg_factor is None else avg_factor)
                out = total / denom
        return self.loss_weight * out


def _reference(pred, target, weight, beta, reduction, loss_weight,
               avg_factor=None):
    sig = jax.nn.sigmoid(pred)
    focal = jnp.abs(target - sig) ** beta
    bce = jnp.maximum(pred, 0.0) - pred * target + jnp.log1p(jnp.exp(-jnp.abs(pred)))
    loss = focal * bce * weight
    if reduction == "none":
        red = loss
    elif reduction == "sum":
        red = jnp.sum(loss)
    else:
        red = jnp.sum(loss) / (pred.shape[0] if avg_factor is None else avg_factor)
    return loss_weight * red


if __name__ == "__main__":
    key = jax.random.PRNGKey(0)
    k1, k2, k3, k4, k5 = jax.random.split(key, 5)

    # --- weighted case, N multiple of the tile ---
    N = 2048
    pred = jax.random.normal(k1, (N,), jnp.float32) * 2.0      # logits
    target = jax.random.uniform(k2, (N,), jnp.float32)          # quality in [0,1]
    weight = jax.random.uniform(k3, (N,), jnp.float32)          # per-sample weight

    loss_mod = QualityOnlyFocalLoss(beta=2.0, reduction="mean", loss_weight=1.0)

    out_mean = jax.block_until_ready(loss_mod(pred, target, weight=weight))
    ref_mean = _reference(pred, target, weight, 2.0, "mean", 1.0)
    np.testing.assert_allclose(np.asarray(out_mean), np.asarray(ref_mean),
                               rtol=1e-5, atol=1e-6)

    out_none = jax.block_until_ready(
        loss_mod(pred, target, weight=weight, reduction_override="none"))
    ref_none = _reference(pred, target, weight, 2.0, "none", 1.0)
    np.testing.assert_allclose(np.asarray(out_none), np.asarray(ref_none),
                               rtol=1e-5, atol=1e-6)

    out_sum = jax.block_until_ready(
        loss_mod(pred, target, weight=weight, reduction_override="sum"))
    ref_sum = _reference(pred, target, weight, 2.0, "sum", 1.0)
    np.testing.assert_allclose(np.asarray(out_sum), np.asarray(ref_sum),
                               rtol=1e-5, atol=1e-5)

    # --- unweighted case, N NOT a multiple of 128 (exercises in-kernel mask) ---
    M = 1000
    pred_u = jax.random.normal(k4, (M,), jnp.float32) * 2.0
    target_u = jax.random.uniform(k5, (M,), jnp.float32)
    ones_u = jnp.ones((M,), jnp.float32)

    out_mean_u = jax.block_until_ready(loss_mod(pred_u, target_u))
    ref_mean_u = _reference(pred_u, target_u, ones_u, 2.0, "mean", 1.0)
    np.testing.assert_allclose(np.asarray(out_mean_u), np.asarray(ref_mean_u),
                               rtol=1e-5, atol=1e-6)

    out_sum_u = jax.block_until_ready(
        loss_mod(pred_u, target_u, reduction_override="sum"))
    ref_sum_u = _reference(pred_u, target_u, ones_u, 2.0, "sum", 1.0)
    np.testing.assert_allclose(np.asarray(out_sum_u), np.asarray(ref_sum_u),
                               rtol=1e-5, atol=1e-5)

    out_none_u = jax.block_until_ready(
        loss_mod(pred_u, target_u, reduction_override="none"))
    ref_none_u = _reference(pred_u, target_u, ones_u, 2.0, "none", 1.0)
    np.testing.assert_allclose(np.asarray(out_none_u), np.asarray(ref_none_u),
                               rtol=1e-5, atol=1e-6)

    # --- non-default beta (guarded pow path) + avg_factor ---
    loss_mod_b = QualityOnlyFocalLoss(beta=1.5, reduction="mean", loss_weight=0.5)
    out_b = jax.block_until_ready(
        loss_mod_b(pred, target, weight=weight, avg_factor=777.0))
    ref_b = _reference(pred, target, weight, 1.5, "mean", 0.5, avg_factor=777.0)
    np.testing.assert_allclose(np.asarray(out_b), np.asarray(ref_b),
                               rtol=1e-5, atol=1e-6)

    print("KERNEL_OK")
</pallas_src>

<mosaic_0001>
module attributes {stable_mosaic.version = 11 : i64} {
  func.func @_qfl_sum_kernel(%arg0: i32, %arg1: memref<16x128xf32, #tpu.memory_space<vmem>>, %arg2: memref<16x128xf32, #tpu.memory_space<vmem>>, %arg3: memref<16x128xf32, #tpu.memory_space<vmem>>, %arg4: memref<1x8x128xf32, #tpu.memory_space<vmem>>) attributes {dimension_semantics = [#tpu.dimension_semantics<parallel>], iteration_bounds = array<i64: 1>, scalar_prefetch = 0 : i64, scratch_operands = 0 : i64, tpu.core_type = #tpu.core_type<tc>, window_params = [{transform_indices = @transform_0, window_bounds = array<i64: 16, 128>}, {transform_indices = @transform_1, window_bounds = array<i64: 16, 128>}, {transform_indices = @transform_2, window_bounds = array<i64: 16, 128>}, {transform_indices = @transform_3, window_bounds = array<i64: 1, 8, 128>}]} {
    %c0 = arith.constant 0 : index
    %c0_0 = arith.constant 0 : index
    %0 = vector.load %arg1[%c0, %c0_0] : memref<16x128xf32, #tpu.memory_space<vmem>>, vector<16x128xf32>
    %c0_1 = arith.constant 0 : index
    %c0_2 = arith.constant 0 : index
    %1 = vector.load %arg2[%c0_1, %c0_2] : memref<16x128xf32, #tpu.memory_space<vmem>>, vector<16x128xf32>
    %2 = math.absf %0 : vector<16x128xf32>
    %cst = arith.constant 0.000000e+00 : f32
    %3 = vector.broadcast %cst : f32 to vector<16x128xf32>
    %4 = arith.subf %3, %2 : vector<16x128xf32>
    %5 = math.exp %4 : vector<16x128xf32>
    %cst_3 = arith.constant 1.000000e+00 : f32
    %6 = vector.broadcast %cst_3 : f32 to vector<16x128xf32>
    %7 = arith.addf %6, %5 : vector<16x128xf32>
    %8 = tpu.reciprocal %7 : vector<16x128xf32> -> vector<16x128xf32>
    %cst_4 = arith.constant 0.000000e+00 : f32
    %9 = vector.broadcast %cst_4 : f32 to vector<16x128xf32>
    %10 = arith.cmpf oge, %0, %9 : vector<16x128xf32>
    %11 = arith.mulf %5, %8 : vector<16x128xf32>
    %12 = arith.select %10, %8, %11 : vector<16x128xi1>, vector<16x128xf32>
    %13 = arith.subf %1, %12 : vector<16x128xf32>
    %14 = math.absf %13 : vector<16x128xf32>
    %15 = arith.mulf %14, %14 : vector<16x128xf32>
    %cst_5 = arith.constant 0.000000e+00 : f32
    %16 = vector.broadcast %cst_5 : f32 to vector<16x128xf32>
    %17 = arith.maximumf %0, %16 : vector<16x128xf32>
    %18 = arith.mulf %0, %1 : vector<16x128xf32>
    %19 = arith.subf %17, %18 : vector<16x128xf32>
    %20 = math.log1p %5 : vector<16x128xf32>
    %21 = arith.addf %19, %20 : vector<16x128xf32>
    %22 = arith.mulf %15, %21 : vector<16x128xf32>
    %c0_6 = arith.constant 0 : index
    %c0_7 = arith.constant 0 : index
    %23 = vector.load %arg3[%c0_6, %c0_7] : memref<16x128xf32, #tpu.memory_space<vmem>>, vector<16x128xf32>
    %24 = arith.mulf %22, %23 : vector<16x128xf32>
    %25 = vector.shape_cast %24 : vector<16x128xf32> to vector<2x8x128xf32>
    %cst_8 = arith.constant dense<0.000000e+00> : vector<8x128xf32>
    %26 = vector.multi_reduction <add>, %25, %cst_8 [0] : vector<2x8x128xf32> to vector<8x128xf32>
    %27 = vector.shape_cast %26 : vector<8x128xf32> to vector<1x8x128xf32>
    %c0_9 = arith.constant 0 : index
    %c0_10 = arith.constant 0 : index
    %c0_11 = arith.constant 0 : index
    %28 = vector.load %arg4[%c0_9, %c0_10, %c0_11] : memref<1x8x128xf32, #tpu.memory_space<vmem>>, vector<1x8x128xf32>
    tpu.vector_store %arg4[%c0_9, %c0_10, %c0_11], %27 {strides = array<i32>} : memref<1x8x128xf32, #tpu.memory_space<vmem>>, vector<1x8x128xf32>,
    return
  }
  func.func @transform_0(%arg0: i32) -> (i32, i32) {
    %c0_i32 = arith.constant 0 : i32
    %c0_i32_0 = arith.constant 0 : i32
    return %arg0, %c0_i32 : i32, i32
  }
  func.func @transform_1(%arg0: i32) -> (i32, i32) {
    %c0_i32 = arith.constant 0 : i32
    %c0_i32_0 = arith.constant 0 : i32
    return %arg0, %c0_i32 : i32, i32
  }
  func.func @transform_2(%arg0: i32) -> (i32, i32) {
    %c0_i32 = arith.constant 0 : i32
    %c0_i32_0 = arith.constant 0 : i32
    return %arg0, %c0_i32 : i32, i32
  }
  func.func @transform_3(%arg0: i32) -> (i32, i32, i32) {
    %c0_i32 = arith.constant 0 : i32
    %c0_i32_0 = arith.constant 0 : i32
    %c0_i32_1 = arith.constant 0 : i32
    return %arg0, %c0_i32, %c0_i32_0 : i32, i32, i32
  }
}

</mosaic_0001>

<bundles_post_ra>
// kernel: tpu_custom_call.1
= control target key start
LH: loop header
LB: loop body
LE: loop exit
PB: predicated region body
PF: predicated region fallthrough
CT: control target
= control target key end

     0   :  { %8 = vsyncpa [#allocation3], 0  ;;  %s336_s0 = inlined_call_operand.hbm [shape: f32[16,128], index: 0, kind: input, shape index: {}]   ;;  %s337_s1 = inlined_call_operand.hbm [shape: f32[16,128], index: 1, kind: input, shape index: {}]   ;;  %s338_s2 = inlined_call_operand.hbm [shape: f32[16,128], index: 2, kind: input, shape index: {}]   ;;  %s339_s3 = inlined_call_operand.hbm [shape: f32[1,8,128], index: 3, kind: output, shape index: {}]  }
   0x1   :  { %9 = vsyncpa [#allocation6], 0 }
   0x2   :  { %10 = vsyncpa [#allocation4], 0  ;;  %s246_s12 = smov [#allocation5]   ;;  %s247_s14 = smov [#allocation2]  }
   0x3   :  { %s28_s13 = sshll.u32 %s246_s12, 4  ;;  %s16_s15 = sshll.u32 %s247_s14, 4  ;;  %s29_s13 = int_to_ptr.vmem [resolvable:$true] %s28_s13  ;;  %s272_s15 = int_to_ptr.vmem [resolvable:$true] %s16_s15 }
   0x4   :  { %s152_s18 = scalar_lea.hbm %s337_s1, 256 }
   0x5   :  { %p153_p0 = scmp.ne.s32.totalorder %s337_s1, %s152_s18  ;;  %p156_p1 = scmp.lt.u32.totalorder %s152_s18, %s337_s1 }
   0x7   :  { %p158_p2 = pnand %p156_p1, %p153_p0 }
   0x9   :  { %161 = shalt.err (!%p158_p2)
}
   0xa   :  { %s162_s23 = scalar_lea.vmem %s29_s13, 256  ;;  %p167_p4 = scmp.lt.s32.totalorder %s29_s13, %s29_s13 }
   0xb   :  { %p163_p3 = scmp.ne.s32.totalorder %s29_s13, %s162_s23  ;;  %p168_p5 = scmp.lt.s32.totalorder %s162_s23, %s162_s23 }
   0xd   :  { %p169_p6 = por %p168_p5, %p167_p4 }
   0xf   :  { %p170_p7 = pnand %p169_p6, %p163_p3 }
  0x11   :  { %173 = shalt.err (!%p170_p7)
}
  0x12   :  { %s248_s24 = smov 128   ;;  %s249_s25 = smov 8  }
  0x13   :  { %34 = dma.hbm_to_vmem [thread:$0]  %s337_s1, 256, %s29_s13, [#allocation6], %s248_s24, %s248_s24, %s249_s25  }
  0x14   :  { %s174_s30 = scalar_lea.hbm %s336_s0, 256 }
  0x15   :  { %p175_p8 = scmp.ne.s32.totalorder %s336_s0, %s174_s30  ;;  %p178_p9 = scmp.lt.u32.totalorder %s174_s30, %s336_s0 }
  0x17   :  { %p180_p10 = pnand %p178_p9, %p175_p8 }
  0x19   :  { %183 = shalt.err (!%p180_p10)
}
  0x1a   :  { %s184_s8 = scalar_lea.vmem %s272_s15, 256  ;;  %p189_p12 = scmp.lt.s32.totalorder %s272_s15, %s272_s15 }
  0x1b   :  { %p185_p11 = scmp.ne.s32.totalorder %s272_s15, %s184_s8  ;;  %p190_p13 = scmp.lt.s32.totalorder %s184_s8, %s184_s8 }
  0x1d   :  { %p191_p0 = por %p190_p13, %p189_p12 }
  0x1f   :  { %p192_p1 = pnand %p191_p0, %p185_p11 }
  0x21   :  { %195 = shalt.err (!%p192_p1)
}
  0x22   :  { %22 = dma.hbm_to_vmem [thread:$0]  %s336_s0, 256, %s272_s15, [#allocation3], %s248_s24, %s248_s24, %s249_s25  }
  0x23   :  { %s250_s10 = smov [#allocation7]   ;;  %s196_s14 = scalar_lea.hbm %s338_s2, 256 }
  0x24   :  { %s40_s11 = sshll.u32 %s250_s10, 4  ;;  %p197_p2 = scmp.ne.s32.totalorder %s338_s2, %s196_s14  ;;  %s41_s11 = int_to_ptr.vmem [resolvable:$true] %s40_s11 }
  0x25   :  { %p200_p3 = scmp.lt.u32.totalorder %s196_s14, %s338_s2 }
  0x27   :  { %p202_p4 = pnand %p200_p3, %p197_p2 }
  0x29   :  { %205 = shalt.err (!%p202_p4)
}
  0x2a   :  { %s206_s20 = scalar_lea.vmem %s41_s11, 256  ;;  %p211_p6 = scmp.lt.s32.totalorder %s41_s11, %s41_s11 }
  0x2b   :  { %p207_p5 = scmp.ne.s32.totalorder %s41_s11, %s206_s20  ;;  %p212_p7 = scmp.lt.s32.totalorder %s206_s20, %s206_s20 }
  0x2d   :  { %p213_p8 = por %p212_p7, %p211_p6 }
  0x2f   :  { %p214_p9 = pnand %p213_p8, %p207_p5 }
  0x31   :  { %217 = shalt.err (!%p214_p9)
}
  0x32   :  { %46 = dma.hbm_to_vmem [thread:$0]  %s338_s2, 256, %s41_s11, [#allocation6], %s248_s24, %s248_s24, %s249_s25  }
  0x33   :  { %240 = dma.done.wait [#allocation3], 256  }
  0x34   :  { %241 = vsyncadd [#allocation3], 4294967040 }
  0x35   :  { %242 = dma.done.wait [#allocation6], 512  }
  0x36   :  { %243 = vsyncadd [#allocation6], 4294966784  ;;  %v56_v0 = vld [vmem:[#allocation2] sm:$0xff]  ;;  %v57_v1 = vld [vmem:[#allocation2 + $0x8] sm:$0xff]  ;;  %s251_s2 = smov [#allocation8]  }
  0x37   :  { %v60_v2 = vand.u32 2147483647, %v56_v0  ;;  %v61_v3 = vand.u32 2147483647, %v57_v1  ;;  %v58_v14 = vld [vmem:[#allocation5] sm:$0xff]  ;;  %v59_v15 = vld [vmem:[#allocation5 + $0x8] sm:$0xff] }
  0x38   :  { %v84_v17 = vmax.f32 %v56_v0, 0.0  ;;  %v86_v18 = vmul.f32 %v58_v14, %v56_v0  ;;  %v85_v21 = vmax.f32 %v57_v1, 0.0  ;;  %v87_v22 = vmul.f32 %v59_v15, %v57_v1  ;;  %v112_v48 = vld [vmem:[#allocation7] sm:$0xff]  ;;  %v113_v50 = vld [vmem:[#allocation7 + $0x8] sm:$0xff]  ;;  %s124_s21 = sshll.u32 %s251_s2, 4  ;;  %s125_s21 = int_to_ptr.vmem [resolvable:$true] %s124_s21 }
  0x39   :  { %v62_v4 = vsub.f32 0.0, %v60_v2  ;;  %v63_v5 = vsub.f32 0.0, %v61_v3  ;;  %vm72_vm0 = vcmp.ge.f32.partialorder %v56_v0, 0.0  ;;  %vm73_vm1 = vcmp.ge.f32.partialorder %v57_v1, 0.0  ;;  %s218_s22 = scalar_lea.vmem %s125_s21, 128  ;;  %p223_p11 = scmp.lt.s32.totalorder %s125_s21, %s125_s21 }
  0x3a   :  { %v88_v30 = vsub.f32 %v84_v17, %v86_v18  ;;  %v89_v34 = vsub.f32 %v85_v21, %v87_v22  ;;  %p219_p10 = scmp.ne.s32.totalorder %s125_s21, %s218_s22  ;;  %p224_p12 = scmp.lt.s32.totalorder %s218_s22, %s218_s22 }
  0x3b   :  { %v64_v6 = vmul.f32 1.442695, %v62_v4  ;;  %v66_v7 = vmul.f32 1.442695, %v63_v5 }
  0x3c   :  { %p225_p13 = por %p224_p12, %p223_p11 }
  0x3d   :  { %140 = vpow2.f32 %v64_v6 }
  0x3e   :  { %142 = vpow2.f32 %v66_v7  ;;  %p226_p0 = pnand %p225_p13, %p219_p10 }
  0x47   :  { %v141_v8 = vpop.eup %140 }
  0x48   :  { %v143_v9 = vpop.eup %142  ;;  %v68_v10 = vadd.f32 1.0, %v141_v8  ;;  %v93_v12 = vmul.f32 -0.5, %v141_v8  ;;  %v96_v19 = vand.u32 2147483647, %v141_v8 }
  0x49   :  { %v69_v11 = vadd.f32 1.0, %v143_v9  ;;  %v102_v13 = vmul.f32 -0.5, %v143_v9  ;;  %v105_v23 = vand.u32 2147483647, %v143_v9 }
  0x4a   :  { %144 = vrcp.f32 %v68_v10  ;;  %v94_v16 = vadd.f32 1.0, %v93_v12  ;;  %vm97_vm2 = vcmp.lt.f32.partialorder %v96_v19, 0.0004427343 }
  0x4b   :  { %146 = vrcp.f32 %v69_v11  ;;  %v103_v20 = vadd.f32 1.0, %v102_v13  ;;  %vm106_vm3 = vcmp.lt.f32.partialorder %v105_v23, 0.0004427343 }
  0x4c   :  { %148 = vlog2.f32 %v68_v10  ;;  %v95_v27 = vmul.f32 %v141_v8, %v94_v16 }
  0x4d   :  { %150 = vlog2.f32 %v69_v11  ;;  %v104_v31 = vmul.f32 %v143_v9, %v103_v20 }
  0x54   :  { %v145_v24 = vpop.eup %144 }
  0x55   :  { %v147_v25 = vpop.eup %146  ;;  %v74_v26 = vmul.f32 %v145_v24, %v141_v8 }
  0x56   :  { %v149_v28 = vpop.eup %148  ;;  %v75_v29 = vmul.f32 %v147_v25, %v143_v9 }
  0x57   :  { %v151_v32 = vpop.eup %150  ;;  %v76_v33 = vsel %vm72_vm0, %v145_v24, %v74_v26  ;;  %v92_v35 = vmul.f32 0.6931472, %v149_v28 }
  0x58   :  { %v77_v36 = vsel %vm73_vm1, %v147_v25, %v75_v29  ;;  %v78_v37 = vsub.f32 %v58_v14, %v76_v33  ;;  %v101_v38 = vmul.f32 0.6931472, %v151_v32 }
  0x59   :  { %v79_v39 = vsub.f32 %v59_v15, %v77_v36  ;;  %v98_v40 = vsel %vm97_vm2, %v95_v27, %v92_v35 }
  0x5a   :  { %v80_v41 = vand.u32 2147483647, %v78_v37  ;;  %v107_v42 = vsel %vm106_vm3, %v104_v31, %v101_v38  ;;  %v108_v43 = vadd.f32 %v98_v40, %v88_v30 }
  0x5b   :  { %v81_v44 = vand.u32 2147483647, %v79_v39  ;;  %v109_v45 = vadd.f32 %v107_v42, %v89_v34 }
  0x5c   :  { %v82_v46 = vmul.f32 %v80_v41, %v80_v41 }
  0x5d   :  { %v83_v47 = vmul.f32 %v81_v44, %v81_v44 }
  0x5e   :  { %v110_v49 = vmul.f32 %v108_v43, %v82_v46 }
  0x5f   :  { %v111_v51 = vmul.f32 %v109_v45, %v83_v47 }
  0x60   :  { %v114_v52 = vmul.f32 %v112_v48, %v110_v49 }
  0x61   :  { %v115_v53 = vmul.f32 %v113_v50, %v111_v51 }
  0x63   :  { %v116_v54 = vadd.f32 %v115_v53, %v114_v52 }
  0x65   :  { %117 = vst [vmem:[#allocation8] sm:$0xff] %v116_v54 }
  0x66   :  { %229 = shalt.err (!%p226_p0)
}
  0x67   :  { %s230_s25 = scalar_lea.hbm %s339_s3, 128 }
  0x68   :  { %p231_p1 = scmp.ne.s32.totalorder %s339_s3, %s230_s25  ;;  %p234_p2 = scmp.lt.u32.totalorder %s230_s25, %s339_s3 }
  0x6a   :  { %p236_p3 = pnand %p234_p2, %p231_p1 }
  0x6c   :  { %239 = shalt.err (!%p236_p3)
}
  0x6d   :  { %127 = dma.vmem_to_hbm [thread:$0]  %s125_s21, 128, %s339_s3, [#allocation4]  }
  0x6e   :  { %244 = dma.done.wait [#allocation4], 128  }
  0x6f   :  { %245 = vsyncadd [#allocation4], 4294967168 }
  0x70   :  { %131 = vsyncpa [#allocation3], 1 }
  0x71   :  { %132 = vsyncpa [#allocation6], 1 }
  0x72   :  { %133 = vsyncpa [#allocation4], 1 }

</bundles_post_ra>
